<compile_context>
chip_gen: v7x
topology: tpu7x:2x2x1
jax: 0.10.0
libtpu: 0.0.40
codegen_flags: <defaults>
</compile_context>

<pallas_src>
import math

import numpy as np
import jax
import jax.numpy as jnp
from jax.experimental import pallas as pl
from jax.experimental.pallas import tpu as pltpu


def _round_up(x, m):
    return (x + m - 1) // m * m


def _cdiv(a, b):
    return (a + b - 1) // b


def _key_stream(key):
    while True:
        key, sub = jax.random.split(key)
        yield sub


# ---------------------------------------------------------------------------
# Kernel
# ---------------------------------------------------------------------------
def make_mlp_kernel(n_hidden, y_range):
    """MLP kernel; BatchNorms pre-folded, dropout = identity.

    Ref order:
      x_in, (w_i, b_i) * n_hidden, wo, bo, out_ref
    """

    def kernel(*refs):
        it = iter(refs)
        x = next(it)[...]                       # [tb, n_in]  (compute dtype)

        h = x
        for li in range(n_hidden):
            w = next(it)[...]                   # [in_i, out_i]
            b = next(it)[...]                   # [1, out_i]  f32
            src = h if li == 0 else h.astype(w.dtype)
            h = jnp.maximum(
                jnp.dot(src, w, preferred_element_type=jnp.float32) + b, 0.0)

        wo = next(it)[...]                      # [s_last, out_sz]
        bo = next(it)[...]                      # [1, out_sz]  f32
        out = jnp.dot(h.astype(wo.dtype), wo,
                      preferred_element_type=jnp.float32) + bo

        if y_range is not None:
            lo, hi = y_range
            out = jax.nn.sigmoid(out) * (hi - lo) + lo

        out_ref = next(it)
        out_ref[...] = out.astype(out_ref.dtype)

    return kernel


# ---------------------------------------------------------------------------
# Parameter construction (deterministic, mirrors the torch __init__)
# ---------------------------------------------------------------------------
def init_params(key, emb_szs, n_cont, szs, out_sz):
    ks = _key_stream(key)
    params = {}

    # embeddings: uniform(-sc, sc), sc = 2/(dim+1)
    emb_ws = []
    for (c, s) in emb_szs:
        sc = 2.0 / (s + 1)
        emb_ws.append(jax.random.uniform(next(ks), (c, s), jnp.float32, -sc, sc))
    params["emb_ws"] = emb_ws
    n_emb = sum(s for _, s in emb_szs)

    dims = [n_emb + n_cont] + list(szs)
    lins = []
    for i in range(len(dims) - 1):
        fan_in, fan_out = dims[i], dims[i + 1]
        std = math.sqrt(2.0 / fan_in)               # kaiming_normal_, relu gain
        w = std * jax.random.normal(next(ks), (fan_out, fan_in), jnp.float32)
        bound = 1.0 / math.sqrt(fan_in)
        b = jax.random.uniform(next(ks), (fan_out,), jnp.float32, -bound, bound)
        lins.append((w, b))
    params["lins"] = lins

    std = math.sqrt(2.0 / dims[-1])
    wo = std * jax.random.normal(next(ks), (out_sz, dims[-1]), jnp.float32)
    bound = 1.0 / math.sqrt(dims[-1])
    bo = jax.random.uniform(next(ks), (out_sz,), jnp.float32, -bound, bound)
    params["outp"] = (wo, bo)

    # BatchNorm eval-mode stats (randomized so the BN-folding path is tested).
    def rand_bn(n):
        g = jax.random.uniform(next(ks), (1, n), jnp.float32, 0.5, 1.5)
        b = 0.1 * jax.random.normal(next(ks), (1, n), jnp.float32)
        m = 0.5 * jax.random.normal(next(ks), (1, n), jnp.float32)
        v = jax.random.uniform(next(ks), (1, n), jnp.float32, 0.5, 1.5)
        return (g, b, m, v)

    params["bn_cont"] = rand_bn(n_cont)
    params["bns"] = [rand_bn(s) for s in szs]
    params["n_emb"] = n_emb
    return params


# ---------------------------------------------------------------------------
# One-time inference prep: BN folding, weight transposition, dtype cast.
# ---------------------------------------------------------------------------
def prepare_inference_params(params, *, use_bn, eps=1e-5,
                             compute_dtype=jnp.bfloat16):
    n_emb = params["n_emb"]
    lins = params["lins"]

    def bn_scale_shift(bn):
        g, b, m, v = bn
        s = g / jnp.sqrt(v + eps)                   # (1, n)
        t = b - m * s
        return s, t

    # pre-transpose to [in, out] once
    wts = [w.T.astype(jnp.float32) for (w, _) in lins]
    bts = [b.reshape(1, -1).astype(jnp.float32) for (_, b) in lins]
    wo, bo = params["outp"]
    wot = wo.T.astype(jnp.float32)
    bot = bo.reshape(1, -1).astype(jnp.float32)

    # fold bn_cont (always applied) into the continuous half of layer 0,
    # then re-concatenate into one [n_emb + n_cont, s1] matrix (the torch
    # cat([emb, bn(cont)], 1) becomes a single fused matmul).
    s_c, t_c = bn_scale_shift(params["bn_cont"])
    w1 = wts[0]
    w1e = w1[:n_emb, :]
    w1c_raw = w1[n_emb:, :]
    w1c = w1c_raw * s_c.reshape(-1, 1)
    b1 = bts[0] + t_c @ w1c_raw
    w1_fused = jnp.concatenate([w1e, w1c], axis=0)

    # fold hidden-layer BN_i (applied after ReLU_i) into layer i+1
    layers = [(w1_fused, b1)]
    for i in range(1, len(lins)):
        w, b = wts[i], bts[i]
        if use_bn:
            s, t = bn_scale_shift(params["bns"][i - 1])
            b = b + t @ w          # uses the unscaled (transposed) weight
            w = w * s.reshape(-1, 1)
        layers.append((w, b))

    # fold the last hidden BN into the output head
    if use_bn:
        s, t = bn_scale_shift(params["bns"][len(lins) - 1])
        bot = bot + t @ wot
        wot = wot * s.reshape(-1, 1)

    cd = compute_dtype
    weight_inputs = []
    for (w, b) in layers:
        weight_inputs += [w.astype(cd), b]          # biases stay f32
    weight_inputs += [wot.astype(cd), bot]

    return {
        # cast tables once so the gather + streamed x_in are in compute dtype
        "emb_ws": [e.astype(cd) for e in params["emb_ws"]],
        "weight_inputs": weight_inputs,
        "n_hidden": len(lins),
        "out_sz": int(wot.shape[1]),
        "compute_dtype": cd,
    }


# ---------------------------------------------------------------------------
# Tiling: minimize batch padding; keep an even tile count for v7x megacore
# ---------------------------------------------------------------------------
def _choose_tiling(B, tile_b):
    n_tiles = max(1, _cdiv(B, tile_b))
    # v7x has 2 TensorCores; keep an even tile count when the batch is large
    # enough to split usefully (no effect on correctness for v5e/v6e).
    if n_tiles % 2 == 1 and B >= 512:
        n_tiles += 1
    tb = _round_up(_cdiv(B, n_tiles), 8)
    n_tiles = _cdiv(B, tb)
    b_pad = n_tiles * tb
    return tb, n_tiles, b_pad


# ---------------------------------------------------------------------------
# Forward wrapper
# ---------------------------------------------------------------------------
def mixed_input_forward(prep, x_cat, x_cont, *, y_range=None, tile_b=4096):
    cd = prep["compute_dtype"]
    out_sz = prep["out_sz"]
    B = x_cat.shape[0]

    # embedding gathers + concat: cheap glue in plain JAX (eval: emb_drop = id)
    # TODO(synk): move the categorical gather in-kernel (x_cat as int32 stream
    # + VMEM-resident tables) to skip this HBM round trip.
    emb_cols = [prep["emb_ws"][i][x_cat[:, i]] for i in range(x_cat.shape[1])]
    x_in = jnp.concatenate(emb_cols + [x_cont.astype(cd)], axis=1)   # [B, n_in]
    n_in = x_in.shape[1]

    tb, n_tiles, b_pad = _choose_tiling(B, tile_b)
    if b_pad != B:
        x_in = jnp.pad(x_in, ((0, b_pad - B), (0, 0)))

    kernel = make_mlp_kernel(prep["n_hidden"], y_range)
    weights = prep["weight_inputs"]

    def build_and_run(single_buffer_consts):
        def const_spec(arr):
            idx = lambda i: (0, 0)
            if single_buffer_consts:
                return pl.BlockSpec(arr.shape, idx,
                                    pipeline_mode=pl.Buffered(1))
            return pl.BlockSpec(arr.shape, idx)

        in_specs = [pl.BlockSpec((tb, n_in), lambda i: (i, 0))]
        in_specs += [const_spec(w) for w in weights]

        return pl.pallas_call(
            kernel,
            grid=(n_tiles,),
            out_shape=jax.ShapeDtypeStruct((b_pad, out_sz), jnp.float32),
            in_specs=in_specs,
            # full-dim last block dim (== out_sz) -> legal, no lane padding
            out_specs=pl.BlockSpec((tb, out_sz), lambda i: (i, 0)),
            compiler_params=pltpu.CompilerParams(
                dimension_semantics=("parallel",)),   # megacore split on v7x
        )(x_in, *weights)

    try:
        out = build_and_run(True)
    except Exception:
        # fallback if this jax build rejects pipeline_mode on a pallas_call
        # BlockSpec; behaviour is identical, just double-buffered constants.
        out = build_and_run(False)

    return out[:B, :]


# ---------------------------------------------------------------------------
# Pure-JAX reference (torch semantics, f32)
# ---------------------------------------------------------------------------
def reference_forward(params, x_cat, x_cont, *, use_bn=False, y_range=None,
                      eps=1e-5):
    emb_cols = [params["emb_ws"][i][x_cat[:, i]] for i in range(x_cat.shape[1])]
    x = jnp.concatenate(emb_cols, axis=1)
    cg, cb, cm, cv = params["bn_cont"]
    x2 = (x_cont - cm) / jnp.sqrt(cv + eps) * cg + cb
    x = jnp.concatenate([x, x2], axis=1)
    for li, (w, b) in enumerate(params["lins"]):
        x = jax.nn.relu(x @ w.T + b)
        if use_bn:
            g, be, m, v = params["bns"][li]
            x = (x - m) / jnp.sqrt(v + eps) * g + be
    wo, bo = params["outp"]
    x = x @ wo.T + bo
    if y_range is not None:
        lo, hi = y_range
        x = jax.nn.sigmoid(x) * (hi - lo) + lo
    return x


def _make_inputs(key, emb_szs, n_cont, batch):
    kc, kx = jax.random.split(key)
    x_cat = jnp.stack(
        [jax.random.randint(jax.random.fold_in(kc, i), (batch,), 0, c)
         for i, (c, _) in enumerate(emb_szs)], axis=1).astype(jnp.int32)
    x_cont = jax.random.normal(kx, (batch, n_cont), jnp.float32)
    return x_cat, x_cont


if __name__ == "__main__":
    # small config consistent with the module's constructor
    emb_szs = [(10, 4), (8, 3), (6, 5)]   # (cardinality, emb_dim)
    n_cont = 4
    szs = [32, 16]
    out_sz = 2
    use_bn = True
    y_range = (0.0, 5.0)

    key = jax.random.PRNGKey(0)
    kp, kin1, kin2 = jax.random.split(key, 3)
    params = init_params(kp, emb_szs, n_cont, szs, out_sz)

    prep32 = prepare_inference_params(params, use_bn=use_bn,
                                      compute_dtype=jnp.float32)
    prep16 = prepare_inference_params(params, use_bn=use_bn,
                                      compute_dtype=jnp.bfloat16)

    # --- small batch: single tile --------------------------------------
    x_cat, x_cont = _make_inputs(kin1, emb_szs, n_cont, batch=8)
    ref = reference_forward(params, x_cat, x_cont,
                            use_bn=use_bn, y_range=y_range)

    # f32 compute path: tight check that BN folding / fused layer-0 weight /
    # narrow output block are mathematically exact.
    out32 = jax.block_until_ready(
        mixed_input_forward(prep32, x_cat, x_cont, y_range=y_range))
    np.testing.assert_allclose(np.asarray(out32), np.asarray(ref),
                               rtol=1e-4, atol=1e-4)

    # bf16 streaming path (default for HBM bandwidth): looser tolerance.
    out16 = jax.block_until_ready(
        mixed_input_forward(prep16, x_cat, x_cont, y_range=y_range))
    np.testing.assert_allclose(np.asarray(out16), np.asarray(ref),
                               rtol=5e-2, atol=1e-1)

    # --- larger batch: multi-tile path (even tile count, batch padding) ---
    x_cat2, x_cont2 = _make_inputs(kin2, emb_szs, n_cont, batch=600)
    ref2 = reference_forward(params, x_cat2, x_cont2,
                             use_bn=use_bn, y_range=y_range)
    out2 = jax.block_until_ready(
        mixed_input_forward(prep32, x_cat2, x_cont2, y_range=y_range))
    np.testing.assert_allclose(np.asarray(out2), np.asarray(ref2),
                               rtol=1e-4, atol=1e-4)

    print("KERNEL_OK")
</pallas_src>

<mosaic_0001>
module attributes {stable_mosaic.version = 11 : i64} {
  func.func @kernel(%arg0: i32, %arg1: memref<8x16xf32, #tpu.memory_space<vmem>>, %arg2: memref<16x32xf32, #tpu.memory_space<vmem>>, %arg3: memref<1x32xf32, #tpu.memory_space<vmem>>, %arg4: memref<32x16xf32, #tpu.memory_space<vmem>>, %arg5: memref<1x16xf32, #tpu.memory_space<vmem>>, %arg6: memref<16x2xf32, #tpu.memory_space<vmem>>, %arg7: memref<1x2xf32, #tpu.memory_space<vmem>>, %arg8: memref<8x2xf32, #tpu.memory_space<vmem>>) attributes {dimension_semantics = [#tpu.dimension_semantics<parallel>], iteration_bounds = array<i64: 1>, scalar_prefetch = 0 : i64, scratch_operands = 0 : i64, tpu.core_type = #tpu.core_type<tc>, window_params = [{transform_indices = @transform_0, window_bounds = array<i64: 8, 16>}, {pipeline_mode = #tpu.pipeline_mode<synchronous>, transform_indices = @transform_1, window_bounds = array<i64: 16, 32>}, {pipeline_mode = #tpu.pipeline_mode<synchronous>, transform_indices = @transform_2, window_bounds = array<i64: 1, 32>}, {pipeline_mode = #tpu.pipeline_mode<synchronous>, transform_indices = @transform_3, window_bounds = array<i64: 32, 16>}, {pipeline_mode = #tpu.pipeline_mode<synchronous>, transform_indices = @transform_4, window_bounds = array<i64: 1, 16>}, {pipeline_mode = #tpu.pipeline_mode<synchronous>, transform_indices = @transform_5, window_bounds = array<i64: 16, 2>}, {pipeline_mode = #tpu.pipeline_mode<synchronous>, transform_indices = @transform_6, window_bounds = array<i64: 1, 2>}, {transform_indices = @transform_7, window_bounds = array<i64: 8, 2>}]} {
    %c0 = arith.constant 0 : index
    %c0_0 = arith.constant 0 : index
    %0 = vector.load %arg1[%c0, %c0_0] : memref<8x16xf32, #tpu.memory_space<vmem>>, vector<8x16xf32>
    %c0_1 = arith.constant 0 : index
    %c0_2 = arith.constant 0 : index
    %1 = vector.load %arg2[%c0_1, %c0_2] : memref<16x32xf32, #tpu.memory_space<vmem>>, vector<16x32xf32>
    %c0_3 = arith.constant 0 : index
    %c0_4 = arith.constant 0 : index
    %2 = vector.load %arg3[%c0_3, %c0_4] : memref<1x32xf32, #tpu.memory_space<vmem>>, vector<1x32xf32>
    %cst = arith.constant dense<0.000000e+00> : vector<8x32xf32>
    %3 = tpu.matmul %0, %1, %cst {dimension_numbers = #tpu.dot_dimension_numbers<[1], [0], [0], [1], [0, 0, 1, 1], [], []>} : vector<8x16xf32>, vector<16x32xf32>, vector<8x32xf32> -> vector<8x32xf32>
    %4 = vector.broadcast %2 : vector<1x32xf32> to vector<8x32xf32>
    %5 = arith.addf %3, %4 : vector<8x32xf32>
    %cst_5 = arith.constant 0.000000e+00 : f32
    %6 = vector.broadcast %cst_5 : f32 to vector<8x32xf32>
    %7 = arith.maximumf %5, %6 : vector<8x32xf32>
    %c0_6 = arith.constant 0 : index
    %c0_7 = arith.constant 0 : index
    %8 = vector.load %arg4[%c0_6, %c0_7] : memref<32x16xf32, #tpu.memory_space<vmem>>, vector<32x16xf32>
    %c0_8 = arith.constant 0 : index
    %c0_9 = arith.constant 0 : index
    %9 = vector.load %arg5[%c0_8, %c0_9] : memref<1x16xf32, #tpu.memory_space<vmem>>, vector<1x16xf32>
    %cst_10 = arith.constant dense<0.000000e+00> : vector<8x16xf32>
    %10 = tpu.matmul %7, %8, %cst_10 {dimension_numbers = #tpu.dot_dimension_numbers<[1], [0], [0], [1], [0, 0, 1, 1], [], []>} : vector<8x32xf32>, vector<32x16xf32>, vector<8x16xf32> -> vector<8x16xf32>
    %11 = vector.broadcast %9 : vector<1x16xf32> to vector<8x16xf32>
    %12 = arith.addf %10, %11 : vector<8x16xf32>
    %cst_11 = arith.constant 0.000000e+00 : f32
    %13 = vector.broadcast %cst_11 : f32 to vector<8x16xf32>
    %14 = arith.maximumf %12, %13 : vector<8x16xf32>
    %c0_12 = arith.constant 0 : index
    %c0_13 = arith.constant 0 : index
    %15 = vector.load %arg6[%c0_12, %c0_13] : memref<16x2xf32, #tpu.memory_space<vmem>>, vector<16x2xf32>
    %c0_14 = arith.constant 0 : index
    %c0_15 = arith.constant 0 : index
    %16 = vector.load %arg7[%c0_14, %c0_15] : memref<1x2xf32, #tpu.memory_space<vmem>>, vector<1x2xf32>
    %cst_16 = arith.constant dense<0.000000e+00> : vector<8x2xf32>
    %17 = tpu.matmul %14, %15, %cst_16 {dimension_numbers = #tpu.dot_dimension_numbers<[1], [0], [0], [1], [0, 0, 1, 1], [], []>} : vector<8x16xf32>, vector<16x2xf32>, vector<8x2xf32> -> vector<8x2xf32>
    %18 = vector.broadcast %16 : vector<1x2xf32> to vector<8x2xf32>
    %19 = arith.addf %17, %18 : vector<8x2xf32>
    %20 = arith.negf %19 : vector<8x2xf32>
    %21 = math.exp %20 : vector<8x2xf32>
    %cst_17 = arith.constant 1.000000e+00 : f32
    %22 = vector.broadcast %cst_17 : f32 to vector<8x2xf32>
    %23 = arith.addf %22, %21 : vector<8x2xf32>
    %24 = arith.divf %22, %23 : vector<8x2xf32>
    %cst_18 = arith.constant 5.000000e+00 : f32
    %25 = vector.broadcast %cst_18 : f32 to vector<8x2xf32>
    %26 = arith.mulf %24, %25 : vector<8x2xf32>
    %cst_19 = arith.constant 0.000000e+00 : f32
    %27 = vector.broadcast %cst_19 : f32 to vector<8x2xf32>
    %28 = arith.addf %26, %27 : vector<8x2xf32>
    %c0_20 = arith.constant 0 : index
    %c0_21 = arith.constant 0 : index
    %29 = vector.load %arg8[%c0_20, %c0_21] : memref<8x2xf32, #tpu.memory_space<vmem>>, vector<8x2xf32>
    tpu.vector_store %arg8[%c0_20, %c0_21], %28 {strides = array<i32>} : memref<8x2xf32, #tpu.memory_space<vmem>>, vector<8x2xf32>,
    return
  }
  func.func @transform_0(%arg0: i32) -> (i32, i32) {
    %c0_i32 = arith.constant 0 : i32
    %c0_i32_0 = arith.constant 0 : i32
    return %arg0, %c0_i32 : i32, i32
  }
  func.func @transform_1(%arg0: i32) -> (i32, i32) {
    %c0_i32 = arith.constant 0 : i32
    %c0_i32_0 = arith.constant 0 : i32
    %c0_i32_1 = arith.constant 0 : i32
    return %c0_i32, %c0_i32_0 : i32, i32
  }
  func.func @transform_2(%arg0: i32) -> (i32, i32) {
    %c0_i32 = arith.constant 0 : i32
    %c0_i32_0 = arith.constant 0 : i32
    %c0_i32_1 = arith.constant 0 : i32
    return %c0_i32, %c0_i32_0 : i32, i32
  }
  func.func @transform_3(%arg0: i32) -> (i32, i32) {
    %c0_i32 = arith.constant 0 : i32
    %c0_i32_0 = arith.constant 0 : i32
    %c0_i32_1 = arith.constant 0 : i32
    return %c0_i32, %c0_i32_0 : i32, i32
  }
  func.func @transform_4(%arg0: i32) -> (i32, i32) {
    %c0_i32 = arith.constant 0 : i32
    %c0_i32_0 = arith.constant 0 : i32
    %c0_i32_1 = arith.constant 0 : i32
    return %c0_i32, %c0_i32_0 : i32, i32
  }
  func.func @transform_5(%arg0: i32) -> (i32, i32) {
    %c0_i32 = arith.constant 0 : i32
    %c0_i32_0 = arith.constant 0 : i32
    %c0_i32_1 = arith.constant 0 : i32
    return %c0_i32, %c0_i32_0 : i32, i32
  }
  func.func @transform_6(%arg0: i32) -> (i32, i32) {
    %c0_i32 = arith.constant 0 : i32
    %c0_i32_0 = arith.constant 0 : i32
    %c0_i32_1 = arith.constant 0 : i32
    return %c0_i32, %c0_i32_0 : i32, i32
  }
  func.func @transform_7(%arg0: i32) -> (i32, i32) {
    %c0_i32 = arith.constant 0 : i32
    %c0_i32_0 = arith.constant 0 : i32
    return %arg0, %c0_i32 : i32, i32
  }
}

module attributes {stable_mosaic.version = 11 : i64} {
  func.func @kernel(%arg0: i32, %arg1: memref<8x16xf32, #tpu.memory_space<vmem>>, %arg2: memref<16x32xf32, #tpu.memory_space<vmem>>, %arg3: memref<1x32xf32, #tpu.memory_space<vmem>>, %arg4: memref<32x16xf32, #tpu.memory_space<vmem>>, %arg5: memref<1x16xf32, #tpu.memory_space<vmem>>, %arg6: memref<16x2xf32, #tpu.memory_space<vmem>>, %arg7: memref<1x2xf32, #tpu.memory_space<vmem>>, %arg8: memref<8x2xf32, #tpu.memory_space<vmem>>) attributes {dimension_semantics = [#tpu.dimension_semantics<parallel>], iteration_bounds = array<i64: 1>, scalar_prefetch = 0 : i64, scratch_operands = 0 : i64, tpu.core_type = #tpu.core_type<tc>, window_params = [{transform_indices = @transform_0, window_bounds = array<i64: 8, 16>}, {pipeline_mode = #tpu.pipeline_mode<synchronous>, transform_indices = @transform_1, window_bounds = array<i64: 16, 32>}, {pipeline_mode = #tpu.pipeline_mode<synchronous>, transform_indices = @transform_2, window_bounds = array<i64: 1, 32>}, {pipeline_mode = #tpu.pipeline_mode<synchronous>, transform_indices = @transform_3, window_bounds = array<i64: 32, 16>}, {pipeline_mode = #tpu.pipeline_mode<synchronous>, transform_indices = @transform_4, window_bounds = array<i64: 1, 16>}, {pipeline_mode = #tpu.pipeline_mode<synchronous>, transform_indices = @transform_5, window_bounds = array<i64: 16, 2>}, {pipeline_mode = #tpu.pipeline_mode<synchronous>, transform_indices = @transform_6, window_bounds = array<i64: 1, 2>}, {transform_indices = @transform_7, window_bounds = array<i64: 8, 2>}]} {
    %c0 = arith.constant 0 : index
    %c0_0 = arith.constant 0 : index
    %0 = vector.load %arg1[%c0, %c0_0] : memref<8x16xf32, #tpu.memory_space<vmem>>, vector<8x16xf32>
    %c0_1 = arith.constant 0 : index
    %c0_2 = arith.constant 0 : index
    %1 = vector.load %arg2[%c0_1, %c0_2] : memref<16x32xf32, #tpu.memory_space<vmem>>, vector<16x32xf32>
    %c0_3 = arith.constant 0 : index
    %c0_4 = arith.constant 0 : index
    %2 = vector.load %arg3[%c0_3, %c0_4] : memref<1x32xf32, #tpu.memory_space<vmem>>, vector<1x32xf32>
    %cst = arith.constant dense<0.000000e+00> : vector<8x32xf32>
    %3 = tpu.matmul %0, %1, %cst {dimension_numbers = #tpu.dot_dimension_numbers<[1], [0], [0], [1], [0, 0, 1, 1], [], []>} : vector<8x16xf32>, vector<16x32xf32>, vector<8x32xf32> -> vector<8x32xf32>
    %4 = vector.broadcast %2 : vector<1x32xf32> to vector<8x32xf32>
    %5 = arith.addf %3, %4 : vector<8x32xf32>
    %cst_5 = arith.constant 0.000000e+00 : f32
    %6 = vector.broadcast %cst_5 : f32 to vector<8x32xf32>
    %7 = arith.maximumf %5, %6 : vector<8x32xf32>
    %c0_6 = arith.constant 0 : index
    %c0_7 = arith.constant 0 : index
    %8 = vector.load %arg4[%c0_6, %c0_7] : memref<32x16xf32, #tpu.memory_space<vmem>>, vector<32x16xf32>
    %c0_8 = arith.constant 0 : index
    %c0_9 = arith.constant 0 : index
    %9 = vector.load %arg5[%c0_8, %c0_9] : memref<1x16xf32, #tpu.memory_space<vmem>>, vector<1x16xf32>
    %cst_10 = arith.constant dense<0.000000e+00> : vector<8x16xf32>
    %10 = tpu.matmul %7, %8, %cst_10 {dimension_numbers = #tpu.dot_dimension_numbers<[1], [0], [0], [1], [0, 0, 1, 1], [], []>} : vector<8x32xf32>, vector<32x16xf32>, vector<8x16xf32> -> vector<8x16xf32>
    %11 = vector.broadcast %9 : vector<1x16xf32> to vector<8x16xf32>
    %12 = arith.addf %10, %11 : vector<8x16xf32>
    %cst_11 = arith.constant 0.000000e+00 : f32
    %13 = vector.broadcast %cst_11 : f32 to vector<8x16xf32>
    %14 = arith.maximumf %12, %13 : vector<8x16xf32>
    %c0_12 = arith.constant 0 : index
    %c0_13 = arith.constant 0 : index
    %15 = vector.load %arg6[%c0_12, %c0_13] : memref<16x2xf32, #tpu.memory_space<vmem>>, vector<16x2xf32>
    %c0_14 = arith.constant 0 : index
    %c0_15 = arith.constant 0 : index
    %16 = vector.load %arg7[%c0_14, %c0_15] : memref<1x2xf32, #tpu.memory_space<vmem>>, vector<1x2xf32>
    %cst_16 = arith.constant dense<0.000000e+00> : vector<8x2xf32>
    %17 = tpu.matmul %14, %15, %cst_16 {dimension_numbers = #tpu.dot_dimension_numbers<[1], [0], [0], [1], [0, 0, 1, 1], [], []>} : vector<8x16xf32>, vector<16x2xf32>, vector<8x2xf32> -> vector<8x2xf32>
    %18 = vector.broadcast %16 : vector<1x2xf32> to vector<8x2xf32>
    %19 = arith.addf %17, %18 : vector<8x2xf32>
    %20 = arith.negf %19 : vector<8x2xf32>
    %21 = math.exp %20 : vector<8x2xf32>
    %cst_17 = arith.constant 1.000000e+00 : f32
    %22 = vector.broadcast %cst_17 : f32 to vector<8x2xf32>
    %23 = arith.addf %22, %21 : vector<8x2xf32>
    %24 = arith.divf %22, %23 : vector<8x2xf32>
    %cst_18 = arith.constant 5.000000e+00 : f32
    %25 = vector.broadcast %cst_18 : f32 to vector<8x2xf32>
    %26 = arith.mulf %24, %25 : vector<8x2xf32>
    %cst_19 = arith.constant 0.000000e+00 : f32
    %27 = vector.broadcast %cst_19 : f32 to vector<8x2xf32>
    %28 = arith.addf %26, %27 : vector<8x2xf32>
    %c0_20 = arith.constant 0 : index
    %c0_21 = arith.constant 0 : index
    %29 = vector.load %arg8[%c0_20, %c0_21] : memref<8x2xf32, #tpu.memory_space<vmem>>, vector<8x2xf32>
    tpu.vector_store %arg8[%c0_20, %c0_21], %28 {strides = array<i32>} : memref<8x2xf32, #tpu.memory_space<vmem>>, vector<8x2xf32>,
    return
  }
  func.func @transform_0(%arg0: i32) -> (i32, i32) {
    %c0_i32 = arith.constant 0 : i32
    %c0_i32_0 = arith.constant 0 : i32
    return %arg0, %c0_i32 : i32, i32
  }
  func.func @transform_1(%arg0: i32) -> (i32, i32) {
    %c0_i32 = arith.constant 0 : i32
    %c0_i32_0 = arith.constant 0 : i32
    %c0_i32_1 = arith.constant 0 : i32
    return %c0_i32, %c0_i32_0 : i32, i32
  }
  func.func @transform_2(%arg0: i32) -> (i32, i32) {
    %c0_i32 = arith.constant 0 : i32
    %c0_i32_0 = arith.constant 0 : i32
    %c0_i32_1 = arith.constant 0 : i32
    return %c0_i32, %c0_i32_0 : i32, i32
  }
  func.func @transform_3(%arg0: i32) -> (i32, i32) {
    %c0_i32 = arith.constant 0 : i32
    %c0_i32_0 = arith.constant 0 : i32
    %c0_i32_1 = arith.constant 0 : i32
    return %c0_i32, %c0_i32_0 : i32, i32
  }
  func.func @transform_4(%arg0: i32) -> (i32, i32) {
    %c0_i32 = arith.constant 0 : i32
    %c0_i32_0 = arith.constant 0 : i32
    %c0_i32_1 = arith.constant 0 : i32
    return %c0_i32, %c0_i32_0 : i32, i32
  }
  func.func @transform_5(%arg0: i32) -> (i32, i32) {
    %c0_i32 = arith.constant 0 : i32
    %c0_i32_0 = arith.constant 0 : i32
    %c0_i32_1 = arith.constant 0 : i32
    return %c0_i32, %c0_i32_0 : i32, i32
  }
  func.func @transform_6(%arg0: i32) -> (i32, i32) {
    %c0_i32 = arith.constant 0 : i32
    %c0_i32_0 = arith.constant 0 : i32
    %c0_i32_1 = arith.constant 0 : i32
    return %c0_i32, %c0_i32_0 : i32, i32
  }
  func.func @transform_7(%arg0: i32) -> (i32, i32) {
    %c0_i32 = arith.constant 0 : i32
    %c0_i32_0 = arith.constant 0 : i32
    return %arg0, %c0_i32 : i32, i32
  }
}

</mosaic_0001>

<bundles_post_ra>
// kernel: tpu_custom_call.1
= control target key start
LH: loop header
LB: loop body
LE: loop exit
PB: predicated region body
PF: predicated region fallthrough
CT: control target
= control target key end

     0   :  { %v355_v0 = vmov 0.0|0.0   ;;  %vm356_vm0 = vmmov 0   ;;  %v357_v3 = vmov 0.0   ;;  %vm36_vm1 = vcmask 130048   ;;  %s442_s1 = inlined_call_operand.vmem [shape: f32[16,32], index: 1, kind: input, shape index: {}]   ;;  %s443_s3 = inlined_call_operand.vmem [shape: f32[32,16], index: 3, kind: input, shape index: {}]   ;;  %s444_s0 = inlined_call_operand.vmem [shape: f32[8,16], index: 0, kind: input, shape index: {}]   ;;  %s445_s2 = inlined_call_operand.vmem [shape: f32[1,32], index: 2, kind: input, shape index: {}]   ;;  %s446_s5 = inlined_call_operand.vmem [shape: f32[16,2], index: 5, kind: input, shape index: {}]   ;;  %s447_s4 = inlined_call_operand.vmem [shape: f32[1,16], index: 4, kind: input, shape index: {}]   ;;  %s448_s6 = inlined_call_operand.vmem [shape: f32[1,2], index: 6, kind: input, shape index: {}]   ;;  %s449_s7 = inlined_call_operand.vmem [shape: f32[8,2], index: 7, kind: output, shape index: {}]  }
   0x1   :  { %336 = vmatprep.subr.bf16.mxu0 %v355_v0  ;;  %v27_v1 = vld [vmem:[%s442_s1] sm:$0xff]  ;;  %v28_v2 = vld [vmem:[%s442_s1 + $0x8] sm:$0xff]  ;;  %315 = vmatprep.mubr.msk.f32.mxu0 %vm356_vm0, %v357_v3  ;;  %v113_v9 = vld [vmem:[%s443_s3 + $0x10] sm:$0xff]  ;;  %vm122_vm2 = vcmask 261120   ;;  %vm287_vm3 = vcmask 15360  }
   0x2   :  { %v337_v4 = vpack.c.bf16 %v28_v2, %v27_v1  ;;  %339 = vmatprep.subr.bf16.mxu1 %v355_v0  ;;  %v111_v5 = vld [vmem:[%s443_s3] sm:$0xff]  ;;  %v112_v6 = vld [vmem:[%s443_s3 + $0x8] sm:$0xff]  ;;  %326 = vmatprep.mubr.msk.f32.mxu1 %vm356_vm0, %v357_v3  ;;  %v114_v10 = vld [vmem:[%s443_s3 + $0x18] sm:$0xff] }
   0x3   :  { %v340_v7 = vpack.c.bf16 %v112_v6, %v111_v5  ;;  %v26_v8 = vld [vmem:[%s444_s0] sm:$0xff]  ;;  %v343_v11 = vpack.c.bf16 %v114_v10, %v113_v9  ;;  %v198_v18 = vld [vmem:[%s446_s5 + $0x8] sm:$0xff] }
   0x4   :  { %338 = vmatpush3.bf16.msra.mxu0 %v337_v4  ;;  %v293_v12 = vld [vmem:[%s445_s2] ss:$0 sm:$0xff] }
   0x5   :  { %341 = vmatpush3.bf16.msra.mxu1 %v340_v7  ;;  %345 = vmatprep.subr.bf16.mxu0 %v355_v0  ;;  %v197_v17 = vld [vmem:[%s446_s5] sm:$0xff] }
   0x6   :  { %342 = vmatprep.subr.bf16.mxu1 %v355_v0  ;;  %v346_v19 = vpack.c.bf16 %v198_v18, %v197_v17  ;;  %v295_v20 = vld [vmem:[%s447_s4] ss:$0 sm:$0xff] }
   0x7   :  { %316 = vmatmul.mubr.msk.f32.vlgmr.msra.gmra.mrb[0].mxu0 %vm36_vm1, %v26_v8  ;;  %v297_v25 = vld [vmem:[%s448_s6] ss:$0 sm:$0xff] }
   0x8   :  { %333 = vmatprep.mubr.msk.f32.mxu0 %vm356_vm0, %v357_v3  ;;  %347 = vmatpush3.bf16.msra.mxu0 %v346_v19 }
   0x9   :  { %344 = vmatpush3.bf16.msra.mxu1 %v343_v11 }
  0xda   :  { %v106_v13 = vpop.f32.mrb[0].mxu0 }
  0xdb   :  { %v107_v14 = vadd.f32 %v293_v12, %v106_v13  ;;  %v317_v15 = vpop.f32.mrb[1].mxu0 }
  0xdd   :  { %v110_v16 = vmax.f32 %v107_v14, 0.0 }
  0xdf   :  { %327 = vmatmul.mubr.msk.f32.vlgmr.msra.gmra.mrb[0].mxu1 %vm122_vm2, %v110_v16 }
 0x1b2   :  { %v192_v21 = vpop.f32.mrb[0].mxu1 }
 0x1b3   :  { %v193_v22 = vadd.f32 %v295_v20, %v192_v21  ;;  %v328_v23 = vpop.f32.mrb[1].mxu1 }
 0x1b5   :  { %v196_v24 = vmax.f32 %v193_v22, 0.0 }
 0x1b7   :  { %334 = vmatmul.mubr.msk.f32.vlgmr.msra.gmra.mrb[2].mxu0 %vm36_vm1, %v196_v24 }
 0x28a   :  { %v275_v26 = vpop.f32.mrb[2].mxu0 }
 0x28b   :  { %v276_v27 = vadd.f32 %v297_v25, %v275_v26  ;;  %v335_v28 = vpop.f32.mrb[3].mxu0 }
 0x28d   :  { %v299_v29 = vmul.f32 -1.442695, %v276_v27 }
 0x28f   :  { %351 = vpow2.f32 %v299_v29 }
 0x299   :  { %v352_v30 = vpop.eup %351 }
 0x29a   :  { %v282_v31 = vadd.f32 1.0, %v352_v30 }
 0x29c   :  { %353 = vrcp.f32 %v282_v31 }
 0x2a6   :  { %v354_v32 = vpop.eup %353 }
 0x2a7   :  { %v285_v33 = vmul.f32 5.0, %v354_v32 }
 0x2a9   :  { %288 = vst.msk [vmem:[%s449_s7] sm:$0xff] %vm287_vm3, %v285_v33 }

// kernel: tpu_custom_call.1
= control target key start
LH: loop header
LB: loop body
LE: loop exit
PB: predicated region body
PF: predicated region fallthrough
CT: control target
= control target key end

     0   :  { %v355_v0 = vmov 0.0|0.0   ;;  %vm356_vm0 = vmmov 0   ;;  %v357_v3 = vmov 0.0   ;;  %vm36_vm1 = vcmask 130048   ;;  %s442_s1 = inlined_call_operand.vmem [shape: f32[16,32], index: 1, kind: input, shape index: {}]   ;;  %s443_s3 = inlined_call_operand.vmem [shape: f32[32,16], index: 3, kind: input, shape index: {}]   ;;  %s444_s0 = inlined_call_operand.vmem [shape: f32[8,16], index: 0, kind: input, shape index: {}]   ;;  %s445_s2 = inlined_call_operand.vmem [shape: f32[1,32], index: 2, kind: input, shape index: {}]   ;;  %s446_s5 = inlined_call_operand.vmem [shape: f32[16,2], index: 5, kind: input, shape index: {}]   ;;  %s447_s4 = inlined_call_operand.vmem [shape: f32[1,16], index: 4, kind: input, shape index: {}]   ;;  %s448_s6 = inlined_call_operand.vmem [shape: f32[1,2], index: 6, kind: input, shape index: {}]   ;;  %s449_s7 = inlined_call_operand.vmem [shape: f32[8,2], index: 7, kind: output, shape index: {}]  }
   0x1   :  { %336 = vmatprep.subr.bf16.mxu0 %v355_v0  ;;  %v27_v1 = vld [vmem:[%s442_s1] sm:$0xff]  ;;  %v28_v2 = vld [vmem:[%s442_s1 + $0x8] sm:$0xff]  ;;  %315 = vmatprep.mubr.msk.f32.mxu0 %vm356_vm0, %v357_v3  ;;  %v113_v9 = vld [vmem:[%s443_s3 + $0x10] sm:$0xff]  ;;  %vm122_vm2 = vcmask 261120   ;;  %vm287_vm3 = vcmask 15360  }
   0x2   :  { %v337_v4 = vpack.c.bf16 %v28_v2, %v27_v1  ;;  %339 = vmatprep.subr.bf16.mxu1 %v355_v0  ;;  %v111_v5 = vld [vmem:[%s443_s3] sm:$0xff]  ;;  %v112_v6 = vld [vmem:[%s443_s3 + $0x8] sm:$0xff]  ;;  %326 = vmatprep.mubr.msk.f32.mxu1 %vm356_vm0, %v357_v3  ;;  %v114_v10 = vld [vmem:[%s443_s3 + $0x18] sm:$0xff] }
   0x3   :  { %v340_v7 = vpack.c.bf16 %v112_v6, %v111_v5  ;;  %v26_v8 = vld [vmem:[%s444_s0] sm:$0xff]  ;;  %v343_v11 = vpack.c.bf16 %v114_v10, %v113_v9  ;;  %v198_v18 = vld [vmem:[%s446_s5 + $0x8] sm:$0xff] }
   0x4   :  { %338 = vmatpush3.bf16.msra.mxu0 %v337_v4  ;;  %v293_v12 = vld [vmem:[%s445_s2] ss:$0 sm:$0xff] }
   0x5   :  { %341 = vmatpush3.bf16.msra.mxu1 %v340_v7  ;;  %345 = vmatprep.subr.bf16.mxu0 %v355_v0  ;;  %v197_v17 = vld [vmem:[%s446_s5] sm:$0xff] }
   0x6   :  { %342 = vmatprep.subr.bf16.mxu1 %v355_v0  ;;  %v346_v19 = vpack.c.bf16 %v198_v18, %v197_v17  ;;  %v295_v20 = vld [vmem:[%s447_s4] ss:$0 sm:$0xff] }
   0x7   :  { %316 = vmatmul.mubr.msk.f32.vlgmr.msra.gmra.mrb[0].mxu0 %vm36_vm1, %v26_v8  ;;  %v297_v25 = vld [vmem:[%s448_s6] ss:$0 sm:$0xff] }
   0x8   :  { %333 = vmatprep.mubr.msk.f32.mxu0 %vm356_vm0, %v357_v3  ;;  %347 = vmatpush3.bf16.msra.mxu0 %v346_v19 }
   0x9   :  { %344 = vmatpush3.bf16.msra.mxu1 %v343_v11 }
  0xda   :  { %v106_v13 = vpop.f32.mrb[0].mxu0 }
  0xdb   :  { %v107_v14 = vadd.f32 %v293_v12, %v106_v13  ;;  %v317_v15 = vpop.f32.mrb[1].mxu0 }
  0xdd   :  { %v110_v16 = vmax.f32 %v107_v14, 0.0 }
  0xdf   :  { %327 = vmatmul.mubr.msk.f32.vlgmr.msra.gmra.mrb[0].mxu1 %vm122_vm2, %v110_v16 }
 0x1b2   :  { %v192_v21 = vpop.f32.mrb[0].mxu1 }
 0x1b3   :  { %v193_v22 = vadd.f32 %v295_v20, %v192_v21  ;;  %v328_v23 = vpop.f32.mrb[1].mxu1 }
 0x1b5   :  { %v196_v24 = vmax.f32 %v193_v22, 0.0 }
 0x1b7   :  { %334 = vmatmul.mubr.msk.f32.vlgmr.msra.gmra.mrb[2].mxu0 %vm36_vm1, %v196_v24 }
 0x28a   :  { %v275_v26 = vpop.f32.mrb[2].mxu0 }
 0x28b   :  { %v276_v27 = vadd.f32 %v297_v25, %v275_v26  ;;  %v335_v28 = vpop.f32.mrb[3].mxu0 }
 0x28d   :  { %v299_v29 = vmul.f32 -1.442695, %v276_v27 }
 0x28f   :  { %351 = vpow2.f32 %v299_v29 }
 0x299   :  { %v352_v30 = vpop.eup %351 }
 0x29a   :  { %v282_v31 = vadd.f32 1.0, %v352_v30 }
 0x29c   :  { %353 = vrcp.f32 %v282_v31 }
 0x2a6   :  { %v354_v32 = vpop.eup %353 }
 0x2a7   :  { %v285_v33 = vmul.f32 5.0, %v354_v32 }
 0x2a9   :  { %288 = vst.msk [vmem:[%s449_s7] sm:$0xff] %vm287_vm3, %v285_v33 }

</bundles_post_ra>
